<compile_context>
chip_gen: v6e
topology: v6e:2x2x1
jax: 0.10.0
libtpu: 0.0.40
codegen_flags: <defaults>
</compile_context>

<pallas_src>
import jax
import jax.numpy as jnp
from jax.experimental import pallas as pl
from jax.experimental.pallas import tpu as pltpu

_LANES = 128


def _kanalysis_kernel(q_ref, p_ref, dq_ref, dp_ref):
    # Upcast to f32 for the arithmetic (no-op for f32 inputs; for bf16 it is
    # free on this memory-bound kernel and matches an f32 reference).
    q = q_ref[...].astype(jnp.float32)
    p = p_ref[...].astype(jnp.float32)
    # dK/dq = q * (p^2 + 1) ; dK/dp = (q^2 + 1) * p
    dq_ref[...] = (q * (p * p + 1.0)).astype(dq_ref.dtype)
    dp_ref[...] = ((q * q + 1.0) * p).astype(dp_ref.dtype)


def _analytic_grads_jax(q, p):
    """Plain-JAX fallback (small inputs): identical math, fused by XLA."""
    qf = q.astype(jnp.float32)
    pf = p.astype(jnp.float32)
    dq = (qf * (pf * pf + 1.0)).astype(q.dtype)
    dp = ((qf * qf + 1.0) * pf).astype(p.dtype)
    return dq, dp


def _sublane_multiple(dtype):
    # Sub-32-bit dtypes pack along sublanes: 8 for 4-byte, 16 for 2-byte,
    # 32 for 1-byte elements.
    itemsize = jnp.dtype(dtype).itemsize
    return max(8, 32 // max(itemsize, 1))


def _round_up(x, m):
    return ((x + m - 1) // m) * m


def kanalysis(q, p, *, block_bytes=2 << 20, min_pallas_elems=128 * 1024):
    """Analytic gradients of K = sum(0.5*(q^2+1)*(p^2+1)) w.r.t. q and p."""
    assert q.shape == p.shape and q.dtype == p.dtype
    orig_shape = q.shape
    dtype = q.dtype
    n = q.size
    itemsize = jnp.dtype(dtype).itemsize
    sub = _sublane_multiple(dtype)

    # Small-input fallback: a standalone custom call is a loss for tiny
    # arrays (extra HBM round-trip + launch cost); let XLA fuse it instead.
    if n < max(min_pallas_elems, sub * _LANES):
        return _analytic_grads_jax(q, p)

    # Flatten to a lane-dense (rows, 128) slab.  Pad ONLY if n is not a
    # multiple of 128; contiguous reshapes are free (no extra HBM pass), and
    # allow_input_fusion lets XLA fold the pad into the call's input DMA.
    pad = (-n) % _LANES
    qf = q.reshape(-1)
    pf = p.reshape(-1)
    if pad:
        qf = jnp.pad(qf, (0, pad))
        pf = jnp.pad(pf, (0, pad))
    rows = (n + pad) // _LANES
    q2 = qf.reshape(rows, _LANES)
    p2 = pf.reshape(rows, _LANES)

    # Byte-budgeted block: ~block_bytes per buffer per array, sublane-aligned.
    # f32 -> 4096 rows (2 MiB), bf16 -> 8192 rows, int8 -> 16384 rows.
    rows_cap = max(sub, (block_bytes // (_LANES * itemsize)) // sub * sub)
    block_rows = min(rows_cap, _round_up(rows, sub))

    grid = (pl.cdiv(rows, block_rows),)
    spec = pl.BlockSpec((block_rows, _LANES), lambda i: (i, 0))

    dq2, dp2 = pl.pallas_call(
        _kanalysis_kernel,
        out_shape=(
            jax.ShapeDtypeStruct((rows, _LANES), dtype),
            jax.ShapeDtypeStruct((rows, _LANES), dtype),
        ),
        grid_spec=pl.GridSpec(
            grid=grid,
            in_specs=[spec, spec],
            out_specs=[spec, spec],
        ),
        compiler_params=pltpu.CompilerParams(
            dimension_semantics=("parallel",),
            # 4 arrays x 2 buffers x <=2 MiB = <=16 MiB; raise the scoped VMEM
            # limit so v5e's 16 MiB default is not hit exactly.
            vmem_limit_bytes=32 << 20,
            # Let XLA fuse cheap producers (pad/reshape) into the call inputs.
            allow_input_fusion=[True, True],
        ),
        cost_estimate=pl.CostEstimate(
            flops=6 * n,
            transcendentals=0,
            bytes_accessed=4 * n * itemsize,
        ),
    )(q2, p2)

    if pad:
        dq = dq2.reshape(-1)[:n].reshape(orig_shape)
        dp = dp2.reshape(-1)[:n].reshape(orig_shape)
    else:
        dq = dq2.reshape(orig_shape)
        dp = dp2.reshape(orig_shape)
    return dq, dp


if __name__ == "__main__":
    key = jax.random.PRNGKey(0)
    kq, kp = jax.random.split(key)

    # 1) Small shape consistent with the module; force the Pallas path so the
    #    kernel itself is exercised (n = 2048, 128-aligned, single block).
    shape = (2, 4, 16, 16)
    q = jax.random.normal(kq, shape, dtype=jnp.float32)
    p = jax.random.normal(kp, shape, dtype=jnp.float32)
    dq, dp = kanalysis(q, p, min_pallas_elems=0)
    jax.block_until_ready((dq, dp))
    assert dq.shape == shape and dp.shape == shape
    assert jnp.allclose(dq, q * (p * p + 1.0), atol=1e-6), "dq mismatch"
    assert jnp.allclose(dp, (q * q + 1.0) * p, atol=1e-6), "dp mismatch"

    # 2) Non-128-aligned size through the Pallas path with a tiny block budget
    #    to exercise the padded input, multi-step grid and partial last block.
    q2 = jax.random.normal(kq, (3, 9, 130), dtype=jnp.float32)
    p2 = jax.random.normal(kp, (3, 9, 130), dtype=jnp.float32)
    dq2, dp2 = kanalysis(q2, p2, block_bytes=8192, min_pallas_elems=0)
    jax.block_until_ready((dq2, dp2))
    assert jnp.allclose(dq2, q2 * (p2 * p2 + 1.0), atol=1e-6), "dq2 mismatch"
    assert jnp.allclose(dp2, (q2 * q2 + 1.0) * p2, atol=1e-6), "dp2 mismatch"

    # 3) Tiny input -> small-size JAX fallback path (default thresholds).
    q3 = jax.random.normal(kq, (3, 5, 7), dtype=jnp.float32)
    p3 = jax.random.normal(kp, (3, 5, 7), dtype=jnp.float32)
    dq3, dp3 = kanalysis(q3, p3)
    jax.block_until_ready((dq3, dp3))
    assert jnp.allclose(dq3, q3 * (p3 * p3 + 1.0), atol=1e-6), "dq3 mismatch"
    assert jnp.allclose(dp3, (q3 * q3 + 1.0) * p3, atol=1e-6), "dp3 mismatch"

    print("KERNEL_OK")
</pallas_src>

<mosaic_0001>
module attributes {stable_mosaic.version = 11 : i64} {
  func.func @_kanalysis_kernel(%arg0: i32, %arg1: memref<16x128xf32, #tpu.memory_space<vmem>>, %arg2: memref<16x128xf32, #tpu.memory_space<vmem>>, %arg3: memref<16x128xf32, #tpu.memory_space<vmem>>, %arg4: memref<16x128xf32, #tpu.memory_space<vmem>>) attributes {dimension_semantics = [#tpu.dimension_semantics<parallel>], iteration_bounds = array<i64: 1>, scalar_prefetch = 0 : i64, scratch_operands = 0 : i64, tpu.core_type = #tpu.core_type<tc>, window_params = [{transform_indices = @transform_0, window_bounds = array<i64: 16, 128>}, {transform_indices = @transform_1, window_bounds = array<i64: 16, 128>}, {transform_indices = @transform_2, window_bounds = array<i64: 16, 128>}, {transform_indices = @transform_3, window_bounds = array<i64: 16, 128>}]} {
    %c0 = arith.constant 0 : index
    %c0_0 = arith.constant 0 : index
    %0 = vector.load %arg1[%c0, %c0_0] : memref<16x128xf32, #tpu.memory_space<vmem>>, vector<16x128xf32>
    %c0_1 = arith.constant 0 : index
    %c0_2 = arith.constant 0 : index
    %1 = vector.load %arg2[%c0_1, %c0_2] : memref<16x128xf32, #tpu.memory_space<vmem>>, vector<16x128xf32>
    %2 = arith.mulf %1, %1 : vector<16x128xf32>
    %cst = arith.constant 1.000000e+00 : f32
    %3 = vector.broadcast %cst : f32 to vector<16x128xf32>
    %4 = arith.addf %2, %3 : vector<16x128xf32>
    %5 = arith.mulf %0, %4 : vector<16x128xf32>
    %c0_3 = arith.constant 0 : index
    %c0_4 = arith.constant 0 : index
    %6 = vector.load %arg3[%c0_3, %c0_4] : memref<16x128xf32, #tpu.memory_space<vmem>>, vector<16x128xf32>
    tpu.vector_store %arg3[%c0_3, %c0_4], %5 {strides = array<i32>} : memref<16x128xf32, #tpu.memory_space<vmem>>, vector<16x128xf32>,
    %7 = arith.mulf %0, %0 : vector<16x128xf32>
    %cst_5 = arith.constant 1.000000e+00 : f32
    %8 = vector.broadcast %cst_5 : f32 to vector<16x128xf32>
    %9 = arith.addf %7, %8 : vector<16x128xf32>
    %10 = arith.mulf %9, %1 : vector<16x128xf32>
    %c0_6 = arith.constant 0 : index
    %c0_7 = arith.constant 0 : index
    %11 = vector.load %arg4[%c0_6, %c0_7] : memref<16x128xf32, #tpu.memory_space<vmem>>, vector<16x128xf32>
    tpu.vector_store %arg4[%c0_6, %c0_7], %10 {strides = array<i32>} : memref<16x128xf32, #tpu.memory_space<vmem>>, vector<16x128xf32>,
    return
  }
  func.func @transform_0(%arg0: i32) -> (i32, i32) {
    %c0_i32 = arith.constant 0 : i32
    %c0_i32_0 = arith.constant 0 : i32
    return %arg0, %c0_i32 : i32, i32
  }
  func.func @transform_1(%arg0: i32) -> (i32, i32) {
    %c0_i32 = arith.constant 0 : i32
    %c0_i32_0 = arith.constant 0 : i32
    return %arg0, %c0_i32 : i32, i32
  }
  func.func @transform_2(%arg0: i32) -> (i32, i32) {
    %c0_i32 = arith.constant 0 : i32
    %c0_i32_0 = arith.constant 0 : i32
    return %arg0, %c0_i32 : i32, i32
  }
  func.func @transform_3(%arg0: i32) -> (i32, i32) {
    %c0_i32 = arith.constant 0 : i32
    %c0_i32_0 = arith.constant 0 : i32
    return %arg0, %c0_i32 : i32, i32
  }
}

</mosaic_0001>

<bundles_post_ra>
// kernel: tpu_custom_call.1
= control target key start
LH: loop header
LB: loop body
LE: loop exit
PB: predicated region body
PF: predicated region fallthrough
CT: control target
= control target key end

     0   :  { %9 = vsyncpa [#allocation3], 0  ;;  %s241_s0 = inlined_call_operand.hbm [shape: f32[16,128], index: 0, kind: input, shape index: {}]   ;;  %s242_s1 = inlined_call_operand.hbm [shape: f32[16,128], index: 1, kind: input, shape index: {}]   ;;  %s243_s2 = inlined_call_operand.hbm [shape: f32[16,128], index: 2, kind: output, shape index: {0}]   ;;  %s244_s3 = inlined_call_operand.hbm [shape: f32[16,128], index: 3, kind: output, shape index: {1}]  }
   0x1   :  { %10 = vsyncpa [#allocation6], 0 }
   0x2   :  { %11 = vsyncpa [#allocation4], 0 }
   0x3   :  { %12 = vsyncpa [#allocation9], 0  ;;  %s191_s12 = smov [#allocation2]  }
   0x4   :  { %s18_s13 = sshll.u32 %s191_s12, 4  ;;  %s19_s13 = int_to_ptr.vmem [resolvable:$true] %s18_s13 }
   0x5   :  { %s111_s14 = scalar_lea.vmem %s19_s13, 256  ;;  %p116_p1 = scmp.lt.s32.totalorder %s19_s13, %s19_s13 }
   0x6   :  { %p112_p0 = scmp.ne.s32.totalorder %s19_s13, %s111_s14  ;;  %p117_p2 = scmp.lt.s32.totalorder %s111_s14, %s111_s14 }
   0x8   :  { %p118_p3 = por %p117_p2, %p116_p1 }
   0xa   :  { %p119_p4 = pnand %p118_p3, %p112_p0 }
   0xc   :  { %122 = shalt.err (!%p119_p4)
}
   0xd   :  { %s192_s15 = smov 128   ;;  %s193_s16 = smov 8  }
   0xe   :  { %24 = dma.hbm_to_vmem [thread:$0]  %s241_s0, 256, %s19_s13, [#allocation3], %s192_s15, %s192_s15, %s193_s16  }
   0xf   :  { %s194_s19 = smov [#allocation5]  }
  0x10   :  { %s30_s20 = sshll.u32 %s194_s19, 4  ;;  %s31_s20 = int_to_ptr.vmem [resolvable:$true] %s30_s20 }
  0x11   :  { %s131_s21 = scalar_lea.vmem %s31_s20, 256  ;;  %p136_p6 = scmp.lt.s32.totalorder %s31_s20, %s31_s20 }
  0x12   :  { %p132_p5 = scmp.ne.s32.totalorder %s31_s20, %s131_s21  ;;  %p137_p7 = scmp.lt.s32.totalorder %s131_s21, %s131_s21 }
  0x14   :  { %p138_p8 = por %p137_p7, %p136_p6 }
  0x16   :  { %p139_p9 = pnand %p138_p8, %p132_p5 }
  0x18   :  { %142 = shalt.err (!%p139_p9)
}
  0x19   :  { %36 = dma.hbm_to_vmem [thread:$0]  %s242_s1, 256, %s31_s20, [#allocation6], %s192_s15, %s192_s15, %s193_s16  }
  0x1a   :  { %183 = dma.done.wait [#allocation3], 256  }
  0x1b   :  { %184 = vsyncadd [#allocation3], 4294967040 }
  0x1c   :  { %185 = dma.done.wait [#allocation6], 256  }
  0x1d   :  { %186 = vsyncadd [#allocation6], 4294967040  ;;  %v43_v0 = vld [vmem:[#allocation2] sm:$0xff]  ;;  %v45_v1 = vld [vmem:[#allocation5] sm:$0xff]  ;;  %s195_s0 = smov [#allocation8]   ;;  %s196_s25 = smov [#allocation7]  }
  0x1e   :  { %v44_v2 = vld [vmem:[#allocation2 + $0x8] sm:$0xff]  ;;  %v47_v3 = vmul.f32 %v45_v1, %v45_v1  ;;  %v55_v4 = vmul.f32 %v43_v0, %v43_v0  ;;  %v46_v5 = vld [vmem:[#allocation5 + $0x8] sm:$0xff]  ;;  %s80_s24 = sshll.u32 %s195_s0, 4  ;;  %s68_s26 = sshll.u32 %s196_s25, 4  ;;  %s81_s24 = int_to_ptr.vmem [resolvable:$true] %s80_s24  ;;  %s69_s26 = int_to_ptr.vmem [resolvable:$true] %s68_s26 }
  0x1f   :  { %v56_v6 = vmul.f32 %v44_v2, %v44_v2  ;;  %v48_v7 = vmul.f32 %v46_v5, %v46_v5  ;;  %s143_s1 = scalar_lea.vmem %s81_s24, 256  ;;  %p148_p11 = scmp.lt.s32.totalorder %s81_s24, %s81_s24 }
  0x20   :  { %v49_v8 = vadd.f32 1.0, %v47_v3  ;;  %v57_v9 = vadd.f32 1.0, %v55_v4  ;;  %p144_p10 = scmp.ne.s32.totalorder %s81_s24, %s143_s1  ;;  %p149_p12 = scmp.lt.s32.totalorder %s143_s1, %s143_s1 }
  0x21   :  { %v58_v10 = vadd.f32 1.0, %v56_v6  ;;  %v50_v11 = vadd.f32 1.0, %v48_v7 }
  0x22   :  { %v51_v12 = vmul.f32 %v49_v8, %v43_v0  ;;  %v59_v13 = vmul.f32 %v57_v9, %v45_v1  ;;  %p150_p13 = por %p149_p12, %p148_p11 }
  0x23   :  { %v60_v14 = vmul.f32 %v58_v10, %v46_v5  ;;  %v52_v15 = vmul.f32 %v50_v11, %v44_v2 }
  0x24   :  { %53 = vst [vmem:[#allocation7] sm:$0xff] %v51_v12  ;;  %61 = vst [vmem:[#allocation8] sm:$0xff] %v59_v13  ;;  %p151_p0 = pnand %p150_p13, %p144_p10 }
  0x25   :  { %62 = vst [vmem:[#allocation8 + $0x8] sm:$0xff] %v60_v14  ;;  %54 = vst [vmem:[#allocation7 + $0x8] sm:$0xff] %v52_v15 }
  0x26   :  { %154 = shalt.err (!%p151_p0)
}
  0x27   :  { %86 = dma.vmem_to_hbm [thread:$0]  %s81_s24, 256, %s244_s3, [#allocation9], %s192_s15, %s192_s15, %s193_s16  }
  0x28   :  { %s163_s29 = scalar_lea.vmem %s69_s26, 256  ;;  %p168_p2 = scmp.lt.s32.totalorder %s69_s26, %s69_s26 }
  0x29   :  { %p164_p1 = scmp.ne.s32.totalorder %s69_s26, %s163_s29  ;;  %p169_p3 = scmp.lt.s32.totalorder %s163_s29, %s163_s29 }
  0x2b   :  { %p170_p4 = por %p169_p3, %p168_p2 }
  0x2d   :  { %p171_p5 = pnand %p170_p4, %p164_p1 }
  0x2f   :  { %174 = shalt.err (!%p171_p5)
}
  0x30   :  { %74 = dma.vmem_to_hbm [thread:$0]  %s69_s26, 256, %s243_s2, [#allocation4], %s192_s15, %s192_s15, %s193_s16  }
  0x31   :  { %187 = dma.done.wait [#allocation4], 256  }
  0x32   :  { %188 = vsyncadd [#allocation4], 4294967040 }
  0x33   :  { %189 = dma.done.wait [#allocation9], 256  }
  0x34   :  { %190 = vsyncadd [#allocation9], 4294967040 }
  0x35   :  { %93 = vsyncpa [#allocation3], 1 }
  0x36   :  { %94 = vsyncpa [#allocation6], 1 }
  0x37   :  { %95 = vsyncpa [#allocation4], 1 }
  0x38   :  { %96 = vsyncpa [#allocation9], 1 }

</bundles_post_ra>
